<compile_context>
chip_gen: v5e
topology: v5e:2x2
jax: 0.10.0
libtpu: 0.0.40
codegen_flags: <defaults>
</compile_context>

<pallas_src>
import functools

import jax
import jax.numpy as jnp
from jax.experimental import pallas as pl
from jax.experimental.pallas import tpu as pltpu


def _round_up(v: int, m: int) -> int:
    return -(-v // m) * m


def _linear_block_kernel(*refs, dropout_p: float, apply_dropout: bool, precision):
    if apply_dropout:
        x_ref, w_ref, b_ref, u_ref, o_ref, acc_ref = refs
    else:
        x_ref, w_ref, b_ref, o_ref, acc_ref = refs
        u_ref = None

    k = pl.program_id(2)

    @pl.when(k == 0)
    def _init():
        # Bias folded into the accumulator init: saves a full-tile VPU add and a
        # per-step broadcast in the epilogue.
        acc_ref[...] = jnp.broadcast_to(b_ref[...].astype(jnp.float32),
                                        acc_ref.shape)

    # Native-dtype operands straight into the MXU; accumulate in f32.
    acc_ref[...] += jnp.dot(x_ref[...], w_ref[...],
                            preferred_element_type=jnp.float32,
                            precision=precision)

    @pl.when(k == pl.num_programs(2) - 1)
    def _epilogue():
        y = jnp.maximum(acc_ref[...], 0.0)  # ReLU
        if apply_dropout:
            # Inverted dropout (matches nn.Dropout training semantics):
            # keep with prob (1 - p), scale kept values by 1/(1 - p).
            keep = u_ref[...] >= jnp.float32(dropout_p)
            scale = (jnp.float32(1.0 / (1.0 - dropout_p))
                     if dropout_p < 1.0 else jnp.float32(0.0))
            y = jnp.where(keep, y * scale, jnp.float32(0.0))
        o_ref[...] = y.astype(o_ref.dtype)


def linear_block(x, w, b, *, dropout_p=0.5, train=False, rng_key=None):
    """Linear -> ReLU -> Dropout.

    x: (B, in_features)   w: (in_features, out_features)   b: (out_features,)
    """
    B, in_features = x.shape
    out_features = w.shape[1]
    dropout_p = float(dropout_p)
    apply_dropout = bool(train) and dropout_p > 0.0
    if apply_dropout and rng_key is None:
        rng_key = jax.random.PRNGKey(0)

    # ---- Tile sizes: sublane-aligned M, lane-dense (multiple-of-128) N and K.
    tm = min(128, _round_up(B, 8))
    tn = min(256, _round_up(out_features, 128))
    tk = min(512, _round_up(in_features, 128))

    Mp = _round_up(B, tm)
    Np = _round_up(out_features, tn)
    Kp = _round_up(in_features, tk)

    # ---- Zero-pad operands to tile multiples (K zero-padding adds 0 to the dot).
    x_p = jnp.pad(x, ((0, Mp - B), (0, Kp - in_features)))
    w_p = jnp.pad(w, ((0, Kp - in_features), (0, Np - out_features)))
    b_p = jnp.pad(b, (0, Np - out_features)).reshape(1, Np)

    grid = (Mp // tm, Np // tn, Kp // tk)

    in_specs = [
        pl.BlockSpec((tm, tk), lambda i, j, k: (i, k)),   # x tile
        pl.BlockSpec((tk, tn), lambda i, j, k: (k, j)),   # W tile
        pl.BlockSpec((1, tn), lambda i, j, k: (0, j)),    # bias (lane-dense)
    ]
    inputs = [x_p, w_p, b_p]
    bytes_accessed = sum(int(a.size) * a.dtype.itemsize for a in inputs)

    if apply_dropout:
        # One uniform per output element; block matches the output tile, so it is
        # DMA'd once per (i, j) and only read in the last-K epilogue.
        u = jax.random.uniform(rng_key, (Mp, Np), jnp.float32)
        in_specs.append(pl.BlockSpec((tm, tn), lambda i, j, k: (i, j)))
        inputs.append(u)
        bytes_accessed += int(u.size) * u.dtype.itemsize

    bytes_accessed += Mp * Np * jnp.dtype(x.dtype).itemsize  # output

    # Full f32 accuracy for f32 inputs (matches the f32 PyTorch module); bf16
    # inputs use the native bf16 MXU path.
    precision = (jax.lax.Precision.HIGHEST
                 if jnp.dtype(x.dtype) == jnp.float32 else None)

    kernel = functools.partial(_linear_block_kernel,
                               dropout_p=dropout_p,
                               apply_dropout=apply_dropout,
                               precision=precision)

    out_padded = pl.pallas_call(
        kernel,
        out_shape=jax.ShapeDtypeStruct((Mp, Np), x.dtype),
        grid_spec=pltpu.PrefetchScalarGridSpec(
            num_scalar_prefetch=0,
            grid=grid,
            in_specs=in_specs,
            out_specs=pl.BlockSpec((tm, tn), lambda i, j, k: (i, j)),
            scratch_shapes=[pltpu.VMEM((tm, tn), jnp.float32)],
        ),
        compiler_params=pltpu.CompilerParams(
            dimension_semantics=("parallel", "parallel", "arbitrary")),
        cost_estimate=pl.CostEstimate(
            flops=2 * Mp * Np * Kp,
            transcendentals=0,
            bytes_accessed=bytes_accessed),
    )(*inputs)

    return out_padded[:B, :out_features]


if __name__ == "__main__":
    # Small shapes implied by the module: a batch of feature vectors.
    B, IN_FEATURES, OUT_FEATURES = 8, 32, 64
    DROPOUT = 0.5

    key = jax.random.PRNGKey(0)
    kx, kw, kb, kd = jax.random.split(key, 4)

    x = jax.random.normal(kx, (B, IN_FEATURES), dtype=jnp.float32)
    # Deterministic parameter init (mimics nn.Linear's uniform(-1/sqrt(in), 1/sqrt(in))).
    bound = 1.0 / (IN_FEATURES ** 0.5)
    w = jax.random.uniform(kw, (IN_FEATURES, OUT_FEATURES), jnp.float32, -bound, bound)
    b = jax.random.uniform(kb, (OUT_FEATURES,), jnp.float32, -bound, bound)

    ref = jnp.maximum(
        jnp.dot(x, w, precision=jax.lax.Precision.HIGHEST) + b, 0.0)

    # Eval mode: dropout is identity.
    out_eval = jax.block_until_ready(
        linear_block(x, w, b, dropout_p=DROPOUT, train=False))
    assert out_eval.shape == (B, OUT_FEATURES)
    assert jnp.allclose(out_eval, ref, atol=1e-4, rtol=1e-4), "eval-mode mismatch"

    # Training mode: inverted dropout applied in the kernel epilogue.
    out_train = jax.block_until_ready(
        linear_block(x, w, b, dropout_p=DROPOUT, train=True, rng_key=kd))
    surv = out_train != 0.0
    assert jnp.allclose(out_train[surv], (ref / (1.0 - DROPOUT))[surv],
                        atol=1e-4, rtol=1e-4), "train-mode mismatch"

    print("KERNEL_OK")
</pallas_src>

<mosaic_0001>
module attributes {stable_mosaic.version = 11 : i64} {
  func.func @_linear_block_kernel(%arg0: i32, %arg1: i32, %arg2: i32, %arg3: memref<8x128xf32, #tpu.memory_space<vmem>>, %arg4: memref<128x128xf32, #tpu.memory_space<vmem>>, %arg5: memref<1x128xf32, #tpu.memory_space<vmem>>, %arg6: memref<8x128xf32, #tpu.memory_space<vmem>>, %arg7: memref<8x128xf32, #tpu.memory_space<vmem>>) attributes {dimension_semantics = [#tpu.dimension_semantics<parallel>, #tpu.dimension_semantics<parallel>, #tpu.dimension_semantics<arbitrary>], iteration_bounds = array<i64: 1, 1, 1>, scalar_prefetch = 0 : i64, scratch_operands = 1 : i64, tpu.core_type = #tpu.core_type<tc>, window_params = [{transform_indices = @transform_0, window_bounds = array<i64: 8, 128>}, {transform_indices = @transform_1, window_bounds = array<i64: 128, 128>}, {transform_indices = @transform_2, window_bounds = array<i64: 1, 128>}, {transform_indices = @transform_3, window_bounds = array<i64: 8, 128>}]} {
    %c0_i32 = arith.constant 0 : i32
    %0 = arith.cmpi eq, %arg2, %c0_i32 : i32
    %1 = arith.extui %0 : i1 to i32
    %c0_i32_0 = arith.constant 0 : i32
    %2 = arith.cmpi ne, %1, %c0_i32_0 : i32
    scf.if %2 {
      %c0_10 = arith.constant 0 : index
      %c0_11 = arith.constant 0 : index
      %12 = vector.load %arg5[%c0_10, %c0_11] : memref<1x128xf32, #tpu.memory_space<vmem>>, vector<1x128xf32>
      %13 = vector.shape_cast %12 : vector<1x128xf32> to vector<1x128xf32>
      %14 = vector.broadcast %13 : vector<1x128xf32> to vector<8x128xf32>
      %c0_12 = arith.constant 0 : index
      %c0_13 = arith.constant 0 : index
      %15 = vector.load %arg7[%c0_12, %c0_13] : memref<8x128xf32, #tpu.memory_space<vmem>>, vector<8x128xf32>
      tpu.vector_store %arg7[%c0_12, %c0_13], %14 {strides = array<i32>} : memref<8x128xf32, #tpu.memory_space<vmem>>, vector<8x128xf32>,
    } else {
    }
    %c0 = arith.constant 0 : index
    %c0_1 = arith.constant 0 : index
    %3 = vector.load %arg7[%c0, %c0_1] : memref<8x128xf32, #tpu.memory_space<vmem>>, vector<8x128xf32>
    %c0_2 = arith.constant 0 : index
    %c0_3 = arith.constant 0 : index
    %4 = vector.load %arg3[%c0_2, %c0_3] : memref<8x128xf32, #tpu.memory_space<vmem>>, vector<8x128xf32>
    %c0_4 = arith.constant 0 : index
    %c0_5 = arith.constant 0 : index
    %5 = vector.load %arg4[%c0_4, %c0_5] : memref<128x128xf32, #tpu.memory_space<vmem>>, vector<128x128xf32>
    %cst = arith.constant dense<0.000000e+00> : vector<8x128xf32>
    %6 = tpu.matmul %4, %5, %cst {dimension_numbers = #tpu.dot_dimension_numbers<[1], [0], [0], [1], [0, 0, 1, 1], [], []>, precision = #tpu.contract_precision<fp32>} : vector<8x128xf32>, vector<128x128xf32>, vector<8x128xf32> -> vector<8x128xf32>
    %7 = arith.addf %3, %6 : vector<8x128xf32>
    %c0_6 = arith.constant 0 : index
    %c0_7 = arith.constant 0 : index
    %8 = vector.load %arg7[%c0_6, %c0_7] : memref<8x128xf32, #tpu.memory_space<vmem>>, vector<8x128xf32>
    tpu.vector_store %arg7[%c0_6, %c0_7], %7 {strides = array<i32>} : memref<8x128xf32, #tpu.memory_space<vmem>>, vector<8x128xf32>,
    %c0_i32_8 = arith.constant 0 : i32
    %9 = arith.cmpi eq, %arg2, %c0_i32_8 : i32
    %10 = arith.extui %9 : i1 to i32
    %c0_i32_9 = arith.constant 0 : i32
    %11 = arith.cmpi ne, %10, %c0_i32_9 : i32
    scf.if %11 {
      %c0_10 = arith.constant 0 : index
      %c0_11 = arith.constant 0 : index
      %12 = vector.load %arg7[%c0_10, %c0_11] : memref<8x128xf32, #tpu.memory_space<vmem>>, vector<8x128xf32>
      %cst_12 = arith.constant 0.000000e+00 : f32
      %13 = vector.broadcast %cst_12 : f32 to vector<8x128xf32>
      %14 = arith.maximumf %12, %13 : vector<8x128xf32>
      %c0_13 = arith.constant 0 : index
      %c0_14 = arith.constant 0 : index
      %15 = vector.load %arg6[%c0_13, %c0_14] : memref<8x128xf32, #tpu.memory_space<vmem>>, vector<8x128xf32>
      tpu.vector_store %arg6[%c0_13, %c0_14], %14 {strides = array<i32>} : memref<8x128xf32, #tpu.memory_space<vmem>>, vector<8x128xf32>,
    } else {
    }
    return
  }
  func.func @transform_0(%arg0: i32, %arg1: i32, %arg2: i32) -> (i32, i32) {
    %c0_i32 = arith.constant 0 : i32
    return %arg0, %arg2 : i32, i32
  }
  func.func @transform_1(%arg0: i32, %arg1: i32, %arg2: i32) -> (i32, i32) {
    %c0_i32 = arith.constant 0 : i32
    return %arg2, %arg1 : i32, i32
  }
  func.func @transform_2(%arg0: i32, %arg1: i32, %arg2: i32) -> (i32, i32) {
    %c0_i32 = arith.constant 0 : i32
    %c0_i32_0 = arith.constant 0 : i32
    return %c0_i32, %arg1 : i32, i32
  }
  func.func @transform_3(%arg0: i32, %arg1: i32, %arg2: i32) -> (i32, i32) {
    %c0_i32 = arith.constant 0 : i32
    return %arg0, %arg1 : i32, i32
  }
}

</mosaic_0001>

<bundles_post_ra>
// kernel: tpu_custom_call.1
= control target key start
LH: loop header
LB: loop body
LE: loop exit
PB: predicated region body
PF: predicated region fallthrough
CT: control target
= control target key end

     0   :  { %8 = vsyncpa [#allocation4], 0  ;;  %s798_s0 = inlined_call_operand.hbm [shape: f32[8,128], index: 0, kind: input, shape index: {}]   ;;  %s799_s1 = inlined_call_operand.hbm [shape: f32[128,128], index: 1, kind: input, shape index: {}]   ;;  %s800_s2 = inlined_call_operand.vmem [shape: f32[1,128], index: 2, kind: input, shape index: {}]   ;;  %s801_s3 = inlined_call_operand.hbm [shape: f32[8,128], index: 3, kind: output, shape index: {}]  }
   0x1   :  { %9 = vsyncpa [#allocation7], 0 }
   0x2   :  { %10 = vsyncpa [#allocation5], 0  ;;  %s16_s14 = sshll.u32 %s798_s0, 4  ;;  %s523_s15 = smov [#allocation3]   ;;  %s17_s14 = int_to_ptr.hbm [resolvable:$true] %s16_s14 }
   0x3   :  { %s18_s16 = sshll.u32 %s523_s15, 4  ;;  %s26_s19 = sshll.u32 %s799_s1, 4  ;;  %s19_s16 = int_to_ptr.vmem [resolvable:$true] %s18_s16  ;;  %s27_s19 = int_to_ptr.hbm [resolvable:$true] %s26_s19 }
   0x4   :  { %21 = dma.hbm_to_vmem [thread:$0]  %s17_s14, 128, %s19_s16, [#allocation4]  }
   0x5   :  { %s524_s20 = smov [#allocation6]   ;;  %s525_s22 = smov 128  }
   0x6   :  { %s28_s21 = sshll.u32 %s524_s20, 4  ;;  %s526_s23 = smov 8   ;;  %s29_s21 = int_to_ptr.vmem [resolvable:$true] %s28_s21 }
   0x7   :  { %34 = dma.hbm_to_vmem [thread:$0]  %s27_s19, 2048, %s29_s21, [#allocation7], %s525_s22, %s525_s22, %s526_s23  }
   0x8   :  { %517 = dma.done.wait [#allocation4], 128  }
   0x9   :  { %518 = vsyncadd [#allocation4], 4294967168 }
   0xa   :  { %519 = dma.done.wait [#allocation7], 2048  }
   0xb   :  { %520 = vsyncadd [#allocation7], 4294965248  ;;  %v71_v0 = vld [vmem:[#allocation6 + $0x78] sm:$0xff]  ;;  %v70_v1 = vld [vmem:[#allocation6 + $0x70] sm:$0xff]  ;;  %s527_s24 = smov [#allocation8]   ;;  %s428_s28 = sshll.u32 %s801_s3, 4  ;;  %s429_s28 = int_to_ptr.hbm [resolvable:$true] %s428_s28 }
   0xc   :  { %v69_v2 = vld [vmem:[#allocation6 + $0x68] sm:$0xff]  ;;  %v554_v3 = vand.u32 4294901760, %v71_v0  ;;  %v556_v4 = vand.u32 4294901760, %v70_v1  ;;  %v68_v6 = vld [vmem:[#allocation6 + $0x60] sm:$0xff]  ;;  %v67_v7 = vld [vmem:[#allocation6 + $0x58] sm:$0xff]  ;;  %s426_s25 = sshll.u32 %s527_s24, 4  ;;  %s427_s25 = int_to_ptr.vmem [resolvable:$true] %s426_s25 }
   0xd   :  { %v558_v5 = vand.u32 4294901760, %v69_v2  ;;  %v66_v8 = vld [vmem:[#allocation6 + $0x50] sm:$0xff]  ;;  %v560_v9 = vand.u32 4294901760, %v68_v6  ;;  %v562_v10 = vand.u32 4294901760, %v67_v7  ;;  %v65_v12 = vld [vmem:[#allocation6 + $0x48] sm:$0xff]  ;;  %v64_v13 = vld [vmem:[#allocation6 + $0x40] sm:$0xff] }
   0xe   :  { %v564_v11 = vand.u32 4294901760, %v66_v8  ;;  %73 = vmatpush.msra.mxu0 %v554_v3  ;;  %v568_v14 = vsub.f32 %v71_v0, %v554_v3  ;;  %v571_v15 = vsub.f32 %v70_v1, %v556_v4  ;;  %v576_v17 = vand.u32 4294901760, %v65_v12  ;;  %v63_v18 = vld [vmem:[#allocation6 + $0x38] sm:$0xff]  ;;  %269 = vmatpush.msra.mxu3 %v554_v3  ;;  %v62_v26 = vld [vmem:[#allocation6 + $0x30] sm:$0xff]  ;;  %v61_v36 = vld [vmem:[#allocation6 + $0x28] sm:$0xff] }
   0xf   :  { %v574_v16 = vsub.f32 %v69_v2, %v558_v5  ;;  %v580_v19 = vsub.f32 %v68_v6, %v560_v9  ;;  %v583_v20 = vsub.f32 %v67_v7, %v562_v10  ;;  %v592_v25 = vand.u32 4294901760, %v64_v13  ;;  %v60_v42 = vld [vmem:[#allocation6 + $0x20] sm:$0xff]  ;;  %v59_v47 = vld [vmem:[#allocation6 + $0x18] sm:$0xff]  ;;  %v58_v55 = vld [vmem:[#allocation6 + $0x10] sm:$0xff] }
  0x10   :  { %v586_v21 = vsub.f32 %v66_v8, %v564_v11  ;;  %75 = vmatpush.msra.mxu0 %v556_v4  ;;  %v115_v22 = vand.u32 4294901760, %v568_v14  ;;  %v121_v23 = vand.u32 4294901760, %v571_v15  ;;  %216 = vmatpush.msra.mxu2 %v568_v14  ;;  %v596_v28 = vand.u32 4294901760, %v63_v18  ;;  %v57_v60 = vld [vmem:[#allocation6 + $0x8] sm:$0xff]  ;;  %v56_v1 = vld [vmem:[#allocation6] sm:$0xff]  ;;  %v55_v7 = vld [vmem:[#allocation3] sm:$0xff] }
  0x11   :  { %v127_v24 = vand.u32 4294901760, %v574_v16  ;;  %v133_v27 = vand.u32 4294901760, %v580_v19  ;;  %v599_v29 = vsub.f32 %v65_v12, %v576_v17  ;;  %271 = vmatpush.msra.mxu3 %v556_v4  ;;  %v139_v33 = vand.u32 4294901760, %v583_v20 }
  0x12   :  { %77 = vmatpush.msra.mxu0 %v558_v5  ;;  %v116_v30 = vsub.f32 %v568_v14, %v115_v22  ;;  %v122_v31 = vsub.f32 %v571_v15, %v121_v23  ;;  %219 = vmatpush.msra.mxu2 %v571_v15  ;;  %v145_v34 = vand.u32 4294901760, %v586_v21  ;;  %v615_v35 = vand.u32 4294901760, %v62_v26 }
  0x13   :  { %v128_v32 = vsub.f32 %v574_v16, %v127_v24  ;;  %273 = vmatpush.msra.mxu3 %v558_v5  ;;  %v134_v39 = vsub.f32 %v580_v19, %v133_v27  ;;  %v623_v40 = vsub.f32 %v64_v13, %v592_v25  ;;  %v151_v41 = vand.u32 4294901760, %v599_v29 }
  0x14   :  { %v117_v37 = vand.u32 4294901760, %v116_v30  ;;  %79 = vmatpush.msra.mxu0 %v560_v9  ;;  %v123_v38 = vand.u32 4294901760, %v122_v31  ;;  %222 = vmatpush.msra.mxu2 %v574_v16  ;;  %v140_v44 = vsub.f32 %v583_v20, %v139_v33  ;;  %v632_v45 = vand.u32 4294901760, %v61_v36 }
  0x15   :  { %275 = vmatpush.msra.mxu3 %v560_v9  ;;  %v129_v43 = vand.u32 4294901760, %v128_v32  ;;  %v635_v46 = vsub.f32 %v63_v18, %v596_v28  ;;  %v146_v48 = vsub.f32 %v586_v21, %v145_v34  ;;  %v135_v49 = vand.u32 4294901760, %v134_v39 }
  0x16   :  { %118 = vmatpush.msra.mxu1 %v117_v37  ;;  %81 = vmatpush.msra.mxu0 %v562_v10  ;;  %v157_v50 = vand.u32 4294901760, %v623_v40  ;;  %v644_v51 = vand.u32 4294901760, %v60_v42  ;;  %v647_v52 = vsub.f32 %v62_v26, %v615_v35  ;;  %v152_v53 = vsub.f32 %v599_v29, %v151_v41 }
  0x17   :  { %225 = vmatpush.msra.mxu2 %v580_v19  ;;  %277 = vmatpush.msra.mxu3 %v562_v10  ;;  %v652_v54 = vand.u32 4294901760, %v59_v47  ;;  %v141_v56 = vand.u32 4294901760, %v140_v44  ;;  %v163_v57 = vand.u32 4294901760, %v635_v46  ;;  %v659_v58 = vsub.f32 %v61_v36, %v632_v45 }
  0x18   :  { %124 = vmatpush.msra.mxu1 %v123_v38  ;;  %83 = vmatpush.msra.mxu0 %v564_v11  ;;  %v147_v59 = vand.u32 4294901760, %v146_v48  ;;  %v158_v61 = vsub.f32 %v623_v40, %v157_v50  ;;  %v169_v62 = vand.u32 4294901760, %v647_v52  ;;  %v668_v63 = vand.u32 4294901760, %v58_v55 }
  0x19   :  { %228 = vmatpush.msra.mxu2 %v583_v20  ;;  %279 = vmatpush.msra.mxu3 %v564_v11  ;;  %v671_v0 = vsub.f32 %v60_v42, %v644_v51  ;;  %v153_v2 = vand.u32 4294901760, %v152_v53  ;;  %v674_v6 = vsub.f32 %v59_v47, %v652_v54  ;;  %v164_v8 = vsub.f32 %v635_v46, %v163_v57 }
  0x1a   :  { %130 = vmatpush.msra.mxu1 %v129_v43  ;;  %85 = vmatpush.msra.mxu0 %v576_v17  ;;  %v175_v12 = vand.u32 4294901760, %v659_v58  ;;  %v683_v13 = vand.u32 4294901760, %v57_v60  ;;  %v685_v18 = vand.u32 4294901760, %v55_v7  ;;  %v687_v26 = vand.u32 4294901760, %v56_v1 }
  0x1b   :  { %231 = vmatpush.msra.mxu2 %v586_v21  ;;  %281 = vmatpush.msra.mxu3 %v576_v17  ;;  %v159_v30 = vand.u32 4294901760, %v158_v61  ;;  %v170_v31 = vsub.f32 %v647_v52, %v169_v62  ;;  %v181_v32 = vand.u32 4294901760, %v671_v0  ;;  %v697_v36 = vsub.f32 %v58_v55, %v668_v63 }
  0x1c   :  { %136 = vmatpush.msra.mxu1 %v135_v49  ;;  %87 = vmatpush.msra.mxu0 %v592_v25  ;;  %v187_v37 = vand.u32 4294901760, %v674_v6  ;;  %v165_v38 = vand.u32 4294901760, %v164_v8  ;;  %v176_v39 = vsub.f32 %v659_v58, %v175_v12  ;;  %v707_v42 = vsub.f32 %v57_v60, %v683_v13 }
  0x1d   :  { %234 = vmatpush.msra.mxu2 %v599_v29  ;;  %283 = vmatpush.msra.mxu3 %v592_v25  ;;  %v105_v43 = vsub.f32 %v55_v7, %v685_v18  ;;  %v171_v44 = vand.u32 4294901760, %v170_v31  ;;  %v182_v47 = vsub.f32 %v671_v0, %v181_v32  ;;  %v193_v48 = vand.u32 4294901760, %v697_v36 }
  0x1e   :  { %142 = vmatpush.msra.mxu1 %v141_v56  ;;  %89 = vmatpush.msra.mxu0 %v596_v28  ;;  %v718_v49 = vsub.f32 %v56_v1, %v687_v26  ;;  %v177_v53 = vand.u32 4294901760, %v176_v39  ;;  %v188_v55 = vsub.f32 %v674_v6, %v187_v37  ;;  %v199_v56 = vand.u32 4294901760, %v707_v42 }
  0x1f   :  { %237 = vmatpush.msra.mxu2 %v623_v40  ;;  %285 = vmatpush.msra.mxu3 %v596_v28  ;;  %v183_v60 = vand.u32 4294901760, %v182_v47  ;;  %v194_v61 = vsub.f32 %v697_v36, %v193_v48 }
  0x20   :  { %148 = vmatpush.msra.mxu1 %v147_v59  ;;  %91 = vmatpush.msra.mxu0 %v615_v35  ;;  %v106_v59 = vand.u32 4294901760, %v105_v43  ;;  %v205_v1 = vand.u32 4294901760, %v718_v49  ;;  %v200_v7 = vsub.f32 %v707_v42, %v199_v56 }
  0x21   :  { %240 = vmatpush.msra.mxu2 %v635_v46  ;;  %287 = vmatpush.msra.mxu3 %v615_v35 }
  0x22   :  { %154 = vmatpush.msra.mxu1 %v153_v2  ;;  %93 = vmatpush.msra.mxu0 %v632_v45  ;;  %v189_v2 = vand.u32 4294901760, %v188_v55  ;;  %v107_v8 = vsub.f32 %v105_v43, %v106_v59  ;;  %v206_v31 = vsub.f32 %v718_v49, %v205_v1 }
  0x23   :  { %243 = vmatpush.msra.mxu2 %v647_v52  ;;  %289 = vmatpush.msra.mxu3 %v632_v45 }
  0x24   :  { %160 = vmatpush.msra.mxu1 %v159_v30  ;;  %95 = vmatpush.msra.mxu0 %v644_v51  ;;  %v195_v30 = vand.u32 4294901760, %v194_v61  ;;  %v108_v39 = vand.u32 4294901760, %v107_v8 }
  0x25   :  { %246 = vmatpush.msra.mxu2 %v659_v58  ;;  %291 = vmatpush.msra.mxu3 %v644_v51 }
  0x26   :  { %166 = vmatpush.msra.mxu1 %v165_v38  ;;  %97 = vmatpush.msra.mxu0 %v652_v54  ;;  %v201_v38 = vand.u32 4294901760, %v200_v7 }
  0x27   :  { %249 = vmatpush.msra.mxu2 %v671_v0  ;;  %293 = vmatpush.msra.mxu3 %v652_v54 }
  0x28   :  { %172 = vmatpush.msra.mxu1 %v171_v44  ;;  %99 = vmatpush.msra.mxu0 %v668_v63  ;;  %v207_v44 = vand.u32 4294901760, %v206_v31 }
  0x29   :  { %252 = vmatpush.msra.mxu2 %v674_v6  ;;  %295 = vmatpush.msra.mxu3 %v668_v63 }
  0x2a   :  { %178 = vmatpush.msra.mxu1 %v177_v53  ;;  %101 = vmatpush.msra.mxu0 %v683_v13 }
  0x2b   :  { %255 = vmatpush.msra.mxu2 %v697_v36  ;;  %297 = vmatpush.msra.mxu3 %v683_v13 }
  0x2c   :  { %184 = vmatpush.msra.mxu1 %v183_v60  ;;  %103 = vmatpush.msra.mxu0 %v687_v26 }
  0x2d   :  { %258 = vmatpush.msra.mxu2 %v707_v42  ;;  %299 = vmatpush.msra.mxu3 %v687_v26 }
  0x2e   :  { %310 = vmatpush.msrb.mxu0 %v115_v22  ;;  %190 = vmatpush.msra.mxu1 %v189_v2 }
  0x2f   :  { %261 = vmatpush.msra.mxu2 %v718_v49  ;;  %303 = vmatmul.f32.vlgmr.msra.gmra.mxu3 %v106_v59 }
  0x30   :  { %314 = vmatpush.msrb.mxu0 %v121_v23  ;;  %196 = vmatpush.msra.mxu1 %v195_v30 }
  0x31   :  { %264 = vmatmul.f32.vlgmr.msra.gmra.mxu2 %v105_v43  ;;  %109 = vmatmul.f32.vlgmr.msra.gmra.mxu0 %v108_v39 }
  0x32   :  { %318 = vmatpush.msrb.mxu0 %v127_v24  ;;  %202 = vmatpush.msra.mxu1 %v201_v38 }
  0x34   :  { %322 = vmatpush.msrb.mxu0 %v133_v27  ;;  %208 = vmatpush.msra.mxu1 %v207_v44 }
  0x35   :  { %210 = vmatmul.f32.vlgmr.msra.gmra.mxu1 %v685_v18 }
  0x36   :  { %377 = vmatpush.msrb.mxu1 %v554_v3  ;;  %326 = vmatpush.msrb.mxu0 %v139_v33 }
  0x38   :  { %379 = vmatpush.msrb.mxu1 %v556_v4  ;;  %330 = vmatpush.msrb.mxu0 %v145_v34 }
  0x3a   :  { %381 = vmatpush.msrb.mxu1 %v558_v5  ;;  %334 = vmatpush.msrb.mxu0 %v151_v41 }
  0x3c   :  { %383 = vmatpush.msrb.mxu1 %v560_v9  ;;  %338 = vmatpush.msrb.mxu0 %v157_v50 }
  0x3e   :  { %385 = vmatpush.msrb.mxu1 %v562_v10  ;;  %342 = vmatpush.msrb.mxu0 %v163_v57 }
  0x40   :  { %387 = vmatpush.msrb.mxu1 %v564_v11  ;;  %346 = vmatpush.msrb.mxu0 %v169_v62 }
  0x42   :  { %389 = vmatpush.msrb.mxu1 %v576_v17  ;;  %350 = vmatpush.msrb.mxu0 %v175_v12  ;;  %v444_v17 = vld [vmem:[%s800_s2] ss:$0 sm:$0xff] }
  0x44   :  { %391 = vmatpush.msrb.mxu1 %v592_v25  ;;  %354 = vmatpush.msrb.mxu0 %v181_v32 }
  0x46   :  { %393 = vmatpush.msrb.mxu1 %v596_v28  ;;  %358 = vmatpush.msrb.mxu0 %v187_v37 }
  0x48   :  { %395 = vmatpush.msrb.mxu1 %v615_v35  ;;  %362 = vmatpush.msrb.mxu0 %v193_v48 }
  0x4a   :  { %397 = vmatpush.msrb.mxu1 %v632_v45  ;;  %366 = vmatpush.msrb.mxu0 %v199_v56 }
  0x4c   :  { %399 = vmatpush.msrb.mxu1 %v644_v51  ;;  %370 = vmatpush.msrb.mxu0 %v205_v1 }
  0x4d   :  { %372 = vmatmul.f32.vlgmr.msrb.gmra.mxu0 %v685_v18 }
  0x4e   :  { %401 = vmatpush.msrb.mxu1 %v652_v54 }
  0x50   :  { %403 = vmatpush.msrb.mxu1 %v668_v63 }
  0x52   :  { %405 = vmatpush.msrb.mxu1 %v683_v13 }
  0x54   :  { %407 = vmatpush.msrb.mxu1 %v687_v26 }
  0x55   :  { %409 = vmatmul.f32.vlgmr.msrb.gmra.mxu1 %v685_v18 }
  0xae   :  { %v110_v4 = vpop.f32.mrf.mxu0 }
  0xb2   :  { %v211_v3 = vpop.f32.mrf.mxu1  ;;  %v304_v11 = vpop.f32.mrf.mxu3 }
  0xb3   :  { %v212_v5 = vadd.f32 %v211_v3, %v110_v4 }
  0xb4   :  { %v265_v9 = vpop.f32.mrf.mxu2 }
  0xb5   :  { %v266_v10 = vadd.f32 %v265_v9, %v212_v5 }
  0xb7   :  { %v305_v14 = vadd.f32 %v304_v11, %v266_v10 }
  0xca   :  { %v373_v15 = vpop.f32.mrf.mxu0 }
  0xcb   :  { %v374_v16 = vadd.f32 %v373_v15, %v305_v14 }
  0xd2   :  { %v410_v19 = vpop.f32.mrf.mxu1 }
  0xd3   :  { %v411_v20 = vadd.f32 %v410_v19, %v374_v16 }
  0xd5   :  { %v413_v21 = vadd.f32 %v444_v17, %v411_v20 }
  0xd7   :  { %v419_v22 = vmax.f32 %v413_v21, 0.0 }
  0xd9   :  { %420 = vst [vmem:[#allocation8] sm:$0xff] %v419_v22 }
  0xda   :  { %431 = dma.vmem_to_hbm [thread:$0]  %s427_s25, 128, %s429_s28, [#allocation5]  }
  0xdb   :  { %521 = dma.done.wait [#allocation5], 128  }
  0xdc   :  { %522 = vsyncadd [#allocation5], 4294967168 }
  0xdd   :  { %436 = vsyncpa [#allocation4], 1 }
  0xde   :  { %437 = vsyncpa [#allocation7], 1 }
  0xdf   :  { %438 = vsyncpa [#allocation5], 1 }

</bundles_post_ra>
